<compile_context>
chip_gen: v6e
topology: v6e:2x2x1
jax: 0.10.0
libtpu: 0.0.40
codegen_flags: <defaults>
</compile_context>

<pallas_src>
import math

import jax
import jax.numpy as jnp
from jax.experimental import pallas as pl
from jax.experimental.pallas import tpu as pltpu

LANE = 128
SUBLANE = 8
# ~4 MiB of input per block: with in+out double buffering this is ~16 MiB of
# VMEM, well under v7x's 32 MiB scoped limit while >=1024 lanes wide.
_TILE_BYTES = 4 * 1024 * 1024
_VMEM_LIMIT = 32 * 1024 * 1024


def _round_down(v: int, m: int) -> int:
    return max(m, (v // m) * m)


def _scale_rows_kernel(scale_ref, x_ref, o_ref):
    """Sublane-dense path. grid = (sample, row-tile); x/o tile: (1, TR, 128).

    scale_ref : SMEM (B,) f32 per-sample keep/scale vector (full array).
    """
    b = pl.program_id(0)
    s = scale_ref[b].astype(o_ref.dtype)   # scalar for this sample, in x dtype
    o_ref[...] = x_ref[...] * s


def _scale_cols_kernel(scale_ref, x_ref, o_ref):
    """General path. grid = (col-tile,); x/o tile: (B, tn); scale: (B, 1) f32."""
    s = scale_ref[...].astype(o_ref.dtype)         # (B, 1), broadcast over lanes
    o_ref[...] = x_ref[...] * s


def drop_path(x, drop_prob: float = 0.0, *, training: bool = False, key=None):
    """Pallas-TPU equivalent of the reference `drop_path(x, drop_prob, training)`.

    `key` is a jax.random key used for the per-sample mask (callers should
    thread distinct keys per layer / step to avoid correlated masks).
    """
    if drop_prob == 0.0 or not training:
        return x
    if not (0.0 <= drop_prob < 1.0):
        raise ValueError(f"drop_prob must be in [0, 1), got {drop_prob}")

    keep_prob = 1.0 - drop_prob
    B = x.shape[0]
    N = int(math.prod(x.shape[1:]))

    if key is None:
        key = jax.random.PRNGKey(0)

    # Hoisted per-sample mask (computed once, not per tile):
    # PyTorch: floor(keep_prob + U[0,1)) == 1  <=>  u >= drop_prob  (keep).
    u = jax.random.uniform(key, (B,), dtype=jnp.float32)
    scale = jnp.where(u >= jnp.float32(drop_prob),
                      jnp.float32(1.0 / keep_prob),
                      jnp.float32(0.0))                       # (B,) f32

    itemsize = jnp.dtype(x.dtype).itemsize
    cost = pl.CostEstimate(flops=B * N, transcendentals=0,
                           bytes_accessed=2 * B * N * itemsize + B * 4)

    if N >= LANE and N % LANE == 0:
        # ---- Sublane-dense path: view as (B, R, 128); full (8,128) vreg
        # density regardless of batch size, per-sample scale read from SMEM.
        R = N // LANE
        x3 = x.reshape(B, R, LANE)
        tr = min(R, _round_down(_TILE_BYTES // (LANE * itemsize), SUBLANE))
        if R >= 2 * SUBLANE and B * pl.cdiv(R, tr) < 2:
            tr = _round_down((R + 1) // 2, SUBLANE)   # >= 2 steps for v7x megacore

        out = pl.pallas_call(
            _scale_rows_kernel,
            out_shape=jax.ShapeDtypeStruct((B, R, LANE), x.dtype),
            grid=(B, pl.cdiv(R, tr)),
            in_specs=[
                pl.BlockSpec(memory_space=pltpu.MemorySpace.SMEM),      # scale (B,)
                pl.BlockSpec((1, tr, LANE), lambda b, r: (b, r, 0)),    # x tile
            ],
            out_specs=pl.BlockSpec((1, tr, LANE), lambda b, r: (b, r, 0)),
            compiler_params=pltpu.CompilerParams(
                dimension_semantics=("parallel", "parallel"),
                vmem_limit_bytes=_VMEM_LIMIT),
            cost_estimate=cost,
        )(scale, x3)
        return out.reshape(x.shape)

    # ---- General path: lane-dense (B, N) with 128-multiple column tiles.
    # A non-128-multiple N is handled by Pallas' masked partial last block —
    # no jnp.pad / slice HBM round trip.
    x2 = x.reshape(B, N)
    tn = _round_down(_TILE_BYTES // max(1, B * itemsize), LANE)
    if tn >= N:
        tn = N                      # single full-width block (full dims are legal)

    out = pl.pallas_call(
        _scale_cols_kernel,
        out_shape=jax.ShapeDtypeStruct((B, N), x.dtype),
        grid=(pl.cdiv(N, tn),),
        in_specs=[
            pl.BlockSpec((B, 1), lambda j: (0, 0)),      # scale (B, 1), resident
            pl.BlockSpec((B, tn), lambda j: (0, j)),     # x column tile
        ],
        out_specs=pl.BlockSpec((B, tn), lambda j: (0, j)),
        compiler_params=pltpu.CompilerParams(
            dimension_semantics=("parallel",),
            vmem_limit_bytes=_VMEM_LIMIT),
        cost_estimate=cost,
    )(scale.reshape(B, 1), x2)
    return out.reshape(x.shape)


class DropPath:
    """Drop paths (stochastic depth) per sample, applied in the main path of
    residual blocks. Pallas-TPU port of the PyTorch module."""

    def __init__(self, drop_prob=None):
        self.drop_prob = 0.0 if drop_prob is None else float(drop_prob)
        self.training = False

    def __call__(self, x, *, key=None):
        return drop_path(x, self.drop_prob, training=self.training, key=key)


if __name__ == "__main__":
    root = jax.random.PRNGKey(0)
    kx, kmask, kmask2, kmask3 = jax.random.split(root, 4)
    x = jax.random.normal(kx, (2, 4, 16, 16), jnp.float32)

    # ---- eval mode: DropPath is the identity --------------------------------
    m = DropPath(drop_prob=0.2)
    y_eval = jax.block_until_ready(m(x))
    assert y_eval.shape == x.shape
    assert bool(jnp.all(y_eval == x)), "eval-mode DropPath must be identity"

    # ---- training, 128-aligned features (N = 4*16*16 = 1024): rows path -----
    m.training = True
    m.drop_prob = 0.5
    y = jax.block_until_ready(m(x, key=kmask))
    keep_prob = 1.0 - m.drop_prob
    u = jax.random.uniform(kmask, (x.shape[0],), dtype=jnp.float32)
    exp_scale = jnp.where(u >= m.drop_prob, 1.0 / keep_prob, 0.0)
    expected = x * exp_scale.reshape(-1, 1, 1, 1)
    assert bool(jnp.allclose(y, expected, rtol=1e-6, atol=1e-6)), "rows-path mismatch"

    # ---- training, unaligned features (N = 3*7*7 = 147): columns path -------
    x_u = jax.random.normal(kx, (2, 3, 7, 7), jnp.float32)
    y_u = jax.block_until_ready(drop_path(x_u, 0.3, training=True, key=kmask2))
    u2 = jax.random.uniform(kmask2, (2,), dtype=jnp.float32)
    exp_scale2 = jnp.where(u2 >= 0.3, 1.0 / 0.7, 0.0)
    expected_u = x_u * exp_scale2.reshape(-1, 1, 1, 1)
    assert bool(jnp.allclose(y_u, expected_u, rtol=1e-6, atol=1e-6)), "cols-path mismatch"

    # ---- bf16 activations: native-dtype multiply in-kernel ------------------
    xb = x.astype(jnp.bfloat16)
    yb = jax.block_until_ready(drop_path(xb, 0.5, training=True, key=kmask3))
    assert yb.dtype == jnp.bfloat16 and yb.shape == x.shape
    u3 = jax.random.uniform(kmask3, (2,), dtype=jnp.float32)
    exp_scale3 = jnp.where(u3 >= 0.5, 2.0, 0.0).astype(jnp.bfloat16)
    expected_b = xb * exp_scale3.reshape(-1, 1, 1, 1)
    assert bool(jnp.allclose(yb.astype(jnp.float32), expected_b.astype(jnp.float32),
                             rtol=1e-2, atol=1e-2)), "bf16 mismatch"

    print("KERNEL_OK")
</pallas_src>

<mosaic_0001>
module attributes {stable_mosaic.version = 11 : i64} {
  func.func @_scale_rows_kernel(%arg0: i32, %arg1: i32, %arg2: memref<2xf32, #tpu.memory_space<smem>>, %arg3: memref<1x8x128xf32, #tpu.memory_space<vmem>>, %arg4: memref<1x8x128xf32, #tpu.memory_space<vmem>>) attributes {dimension_semantics = [#tpu.dimension_semantics<parallel>, #tpu.dimension_semantics<parallel>], iteration_bounds = array<i64: 2, 1>, scalar_prefetch = 0 : i64, scratch_operands = 0 : i64, tpu.core_type = #tpu.core_type<tc>, window_params = [{transform_indices = @transform_0, window_bounds = array<i64: 2>}, {transform_indices = @transform_1, window_bounds = array<i64: 1, 8, 128>}, {transform_indices = @transform_2, window_bounds = array<i64: 1, 8, 128>}]} {
    %0 = arith.index_cast %arg0 : i32 to index
    %1 = memref.load %arg2[%0] : memref<2xf32, #tpu.memory_space<smem>>
    %c0 = arith.constant 0 : index
    %c0_0 = arith.constant 0 : index
    %c0_1 = arith.constant 0 : index
    %2 = vector.load %arg3[%c0, %c0_0, %c0_1] : memref<1x8x128xf32, #tpu.memory_space<vmem>>, vector<1x8x128xf32>
    %3 = vector.broadcast %1 : f32 to vector<1x8x128xf32>
    %4 = arith.mulf %2, %3 : vector<1x8x128xf32>
    %c0_2 = arith.constant 0 : index
    %c0_3 = arith.constant 0 : index
    %c0_4 = arith.constant 0 : index
    %5 = vector.load %arg4[%c0_2, %c0_3, %c0_4] : memref<1x8x128xf32, #tpu.memory_space<vmem>>, vector<1x8x128xf32>
    tpu.vector_store %arg4[%c0_2, %c0_3, %c0_4], %4 {strides = array<i32>} : memref<1x8x128xf32, #tpu.memory_space<vmem>>, vector<1x8x128xf32>,
    return
  }
  func.func @transform_0(%arg0: i32, %arg1: i32) -> i32 {
    %c0_i32 = arith.constant 0 : i32
    %c0_i32_0 = arith.constant 0 : i32
    return %c0_i32 : i32
  }
  func.func @transform_1(%arg0: i32, %arg1: i32) -> (i32, i32, i32) {
    %c0_i32 = arith.constant 0 : i32
    %c0_i32_0 = arith.constant 0 : i32
    return %arg0, %arg1, %c0_i32 : i32, i32, i32
  }
  func.func @transform_2(%arg0: i32, %arg1: i32) -> (i32, i32, i32) {
    %c0_i32 = arith.constant 0 : i32
    %c0_i32_0 = arith.constant 0 : i32
    return %arg0, %arg1, %c0_i32 : i32, i32, i32
  }
}

</mosaic_0001>

<bundles_post_ra>
// kernel: tpu_custom_call.1
= control target key start
LH: loop header
LB: loop body
LE: loop exit
PB: predicated region body
PF: predicated region fallthrough
CT: control target
= control target key end

     0   :  { %7 = vsyncpa [#allocation5], 0  ;;  %s691_s0 = inlined_call_operand.hbm [shape: f32[2], index: 0, kind: input, shape index: {}]   ;;  %s692_s1 = inlined_call_operand.hbm [shape: f32[2,8,128], index: 1, kind: input, shape index: {}]   ;;  %s693_s2 = inlined_call_operand.hbm [shape: f32[2,8,128], index: 2, kind: output, shape index: {}]  }
   0x1   :  { %8 = vsyncpa [#allocation3], 0 }
   0x2   :  { %10 = vsyncpa [#allocation3 + $0x1], 0 }
   0x3   :  { %11 = vsyncpa [#allocation4], 0 }
   0x4   :  { %13 = vsyncpa [#allocation4 + $0x1], 0  ;;  %s531_s9 = smov 0   ;;  %s533_s10 = smov 0  }
   0x5   :  { %s535_s11 = smov 0   ;;  %s537_s12 = smov 0  }
   0x6   :  { %s539_s13 = smov 0   ;;  %s541_s14 = smov 0  }
   0x7 LB: > { %s300_s15 = sadd.s32 4294967295, %s511_s14   ;;  %s301_s16 = sadd.s32 4294967294, %s511_s14   ;;  %s511_s14 = sphi %s541_s14, %s19_s14   ;;  %s507_s13 = sphi %s539_s13, %s710_s13   ;;  %s503_s12 = sphi %s537_s12, %s709_s12   ;;  %s499_s11 = sphi %s535_s11, %s708_s11   ;;  %s495_s10 = sphi %s533_s10, %s707_s10   ;;  %s491_s9 = sphi %s531_s9, %s706_s9  }
   0x8   : > { %p74_p0 = scmp.ne.s32.totalorder %s495_s10, %s491_s9  ;;  %p565_p1 = scmp.eq.s32.totalorder %s300_s15, 0 }
   0x9   : > { %p569_p2 = scmp.eq.s32.totalorder %s300_s15, 1  ;;  %p106_p3 = scmp.eq.s32.totalorder %s301_s16, 1 }
   0xa   : > { %p575_p4 = por %p565_p1, %p74_p0  ;;  %p302_p5 = scmp.ge.s32.totalorder %s511_s14, 1 }
   0xb   : > { %p580_p6 = por %p106_p3, %p74_p0  ;;  %p113_p7 = scmp.lt.s32.totalorder %s511_s14, 3 }
   0xc   : > { %s31_s22 = sadd.s32 1, %s507_s13  ;;  %s61_s23 = sadd.s32 1, %s499_s11 }
   0xd   : > { %s698_s20 = scalar_select %p580_p6, 1, 0 }
   0xe   : > { %p585_p8 = pnand %p302_p5, %p113_p7  ;;  %p33_p12 = scmp.ge.s32.totalorder %s31_s22, 2 }
   0xf   : > { %p68_p13 = scmp.ne.s32.totalorder %s499_s11, %s495_s10  ;;  %p69_p0 = scmp.eq.s32.totalorder %s511_s14, 0 }
  0x10   : > { %p323_p10 = pneg %p585_p8  ;;  %s513_s24 = smov [#allocation2]  }
  0x11   : > { %s712_s22 = smov (%p33_p12, %s31_s22), 0  ;;  %p604_p3 = por %p69_p0, %p68_p13 }
  0x12   : > { %p324_p11 = pnand %p323_p10, %p565_p1  ;;  %p610_p5 = por %p569_p2, %p68_p13 }
  0x13   : > { %s56_s29 = ssub.s32 %s507_s13, %s712_s22  ;;  %p336_p7 = scmp.lt.s32.totalorder %s511_s14, 2 }
  0x14   : > { %326 = dma.hbm_to_smem (!%p324_p11), %s691_s0, 16, %s513_s24, [#allocation5]  }
  0x15   : > { %s701_s28 = scalar_select %p610_p5, 1, 0 }
  0x16   : > { %p59_p10 = scmp.eq.s32.totalorder %s56_s29, 0  ;;  %s135_s30 = sand.u32 1, %s499_s11  }
  0x17   : > { %s305_s3 = sshll.u32 %s135_s30, 3  ;;  %s306_s5 = sshll.u32 %s507_s13, 7 }
  0x18   : > { %s619_s4 = scalar_select %p59_p10, %s499_s11, %s61_s23  }
  0x19   : > { %s145_s8 = scalar_lea.hbm %s692_s1, %s306_s5  ;;  %s139_s15 = scalar_lea.vmem [#allocation6], %s305_s3 }
  0x1a   : > { %s147_s16 = sshll.u32 %s139_s15, 4  ;;  %p627_p2 = pnand %p336_p7, %p604_p3  ;;  %s148_s16 = int_to_ptr.vmem [resolvable:$true] %s147_s16 }
  0x1b   : > { %s136_s24 = scalar_lea.sflag [#allocation3], %s135_s30  ;;  %s412_s25 = scalar_lea.vmem %s148_s16, 128 }
  0x1c   : > { %p401_p11 = pneg %p627_p2  ;;  %p413_p12 = scmp.ne.s32.totalorder %s148_s16, %s412_s25 }
  0x1d   : > { %s514_s23 = smov [#allocation6]  }
  0x1e   : > { %p415_p13 = pnand %p413_p12, %p401_p11  ;;  %s417_s26 = sshll.u32 %s514_s23, 4  ;;  %s418_s26 = int_to_ptr.vmem [resolvable:$false] %s417_s26 }
  0x1f   : > { %s419_s29 = scalar_lea.vmem %s418_s26, 256  ;;  %p420_p10 = scmp.lt.s32.totalorder %s148_s16, %s418_s26 }
  0x20   : > { %p416_p0 = pneg %p415_p13  ;;  %p421_p9 = scmp.lt.s32.totalorder %s419_s29, %s412_s25 }
  0x22   : > { %p422_p6 = por %p421_p9, %p420_p10 }
  0x24   : > { %p423_p5 = pnand %p422_p6, %p416_p0 }
  0x26   : > { %426 = shalt.err (!%p423_p5)
}
  0x27   : > { %330 = dma.hbm_to_vmem [thread:$0]  (!%p627_p2), %s145_s8, 128, %s148_s16, %s136_s24  }
  0x28   : > { %156 = sbr.rel (%p585_p8) target bundleno = 77 (0x4d), region = 28 }
  0x2d   : > { %478 = dma.done.wait (%p565_p1), [#allocation5], 16  }
  0x2e   : > { %480 = vsyncadd (%p565_p1), [#allocation5], 4294967280  ;;  %s642_s27 = sand.u32 1, %s495_s10  }
  0x2f   : > { %s309_s30 = sshll.u32 %s642_s27, 3  ;;  %s163_s3 = scalar_lea.sflag [#allocation3], %s642_s27 }
  0x30   : > { %s166_s5 = scalar_lea.vmem [#allocation6], %s309_s30 }
  0x31   : > { %482 = dma.done.wait (%p575_p4), %s163_s3, 128  }
  0x32   : > { %484 = vsyncadd (%p575_p4), %s163_s3, 4294967168 }
  0x33   : > { %171 = sfence }
  0x34   : > { %s188_s17 = sld [smem:[#allocation2 + %s503_s12]]  ;;  %v189_v0 = vld [vmem:[%s166_s5] sm:$0xff]  ;;  %s187_s21 = scalar_lea.vmem [#allocation7], %s309_s30 }
  0x35   : > { %s208_s6 = sshll.u32 %s187_s21, 4  ;;  %s312_s7 = sshll.u32 %s503_s12, 7  ;;  %s209_s6 = int_to_ptr.vmem [resolvable:$true] %s208_s6 }
  0x36   : > { %s206_s16 = scalar_lea.hbm %s693_s2, %s312_s7  ;;  %s194_s19 = scalar_lea.sflag [#allocation4], %s642_s27 }
  0x37   : > { %s427_s18 = scalar_lea.vmem %s209_s6, 128  ;;  %p703_p4 = scmp.ne.s32.totalorder %s701_s28, 0 }
  0x38   : > { %p428_p1 = scmp.ne.s32.totalorder %s209_s6, %s427_s18  ;;  %s515_s24 = smov [#allocation7]  }
  0x39   : > { %s431_s25 = sshll.u32 %s515_s24, 4  ;;  %s432_s25 = int_to_ptr.vmem [resolvable:$false] %s431_s25 }
  0x3a   : > { %v190_v1 = vstv %s188_s17  ;;  %p429_p6 = pnand %p428_p1, %p703_p4  ;;  %s433_s23 = scalar_lea.vmem %s432_s25, 256 }
  0x3b   : > { %v191_v2 = vmul.f32 %v190_v1, %v189_v0  ;;  %p434_p9 = scmp.lt.s32.totalorder %s209_s6, %s432_s25  ;;  %p435_p3 = scmp.lt.s32.totalorder %s433_s23, %s427_s18 }
  0x3c   : > { %p430_p8 = pneg %p429_p6 }
  0x3d   : > { %192 = vst [vmem:[%s187_s21] sm:$0xff] %v191_v2  ;;  %p436_p5 = por %p435_p3, %p434_p9 }
  0x3f   : > { %p437_p7 = pnand %p436_p5, %p430_p8 }
  0x41   : > { %440 = shalt.err (!%p437_p7)
}
  0x42   : > { %s441_s12 = scalar_lea.hbm %s206_s16, 128  ;;  %s445_s27 = scalar_lea.hbm %s693_s2, 256 }
  0x43   : > { %p442_p2 = scmp.ne.s32.totalorder %s206_s16, %s441_s12  ;;  %p446_p13 = scmp.lt.s32.totalorder %s206_s16, %s693_s2 }
  0x44   : > { %p447_p0 = scmp.lt.s32.totalorder %s445_s27, %s441_s12 }
  0x45   : > { %p443_p11 = pnand %p442_p2, %p703_p4 }
  0x46   : > { %p448_p10 = por %p447_p0, %p446_p13 }
  0x47   : > { %p444_p12 = pneg %p443_p11 }
  0x49   : > { %p449_p1 = pnand %p448_p10, %p444_p12 }
  0x4b   : > { %452 = shalt.err (!%p449_p1)
}
  0x4c   : > { %321 = dma.vmem_to_hbm [thread:$0]  (%p703_p4), %s209_s6, 128, %s206_s16, %s194_s19  }
  0x4d PF: > { %s220_s5 = sand.u32 1, %s491_s9   ;;  %p704_p6 = scmp.ne.s32.totalorder %s698_s20, 0 }
  0x4e   : > { %p705_p8 = scmp.ge.s32.totalorder %s511_s14, 2  ;;  %s221_s17 = scalar_lea.sflag [#allocation4], %s220_s5 }
  0x50   : > { %p332_p9 = pnand %p705_p8, %p704_p6 }
  0x52   : > { %p333_p3 = pneg %p332_p9 }
  0x54   : > { %486 = dma.done.wait (%p333_p3), %s221_s17, 128  }
  0x55   : > { %488 = vsyncadd (%p333_p3), %s221_s17, 4294967168  ;;  %s19_s14 = sadd.s32 1, %s511_s14   ;;  %s706_s9 = smov %s495_s10 }
  0x56   : > { %p16_p5 = scmp.ge.s32.totalorder %s19_s14, 4   ;;  %s707_s10 = smov %s499_s11 }
  0x57   : > { %s708_s11 = smov %s619_s4  ;;  %s709_s12 = smov %s507_s13 }
  0x58   : > { %s710_s13 = smov %s712_s22  ;;  %18 = sbr.rel (!%p16_p5) target bundleno = 7 (0x7), region = 78 }
  0x5d   :  { %226 = vsyncpa [#allocation3], 1 }
  0x5e   :  { %228 = vsyncpa [#allocation3 + $0x1], 1 }
  0x5f   :  { %229 = vsyncpa [#allocation4], 1 }
  0x60   :  { %231 = vsyncpa [#allocation4 + $0x1], 1 }
  0x61   :  { %232 = vsyncpa [#allocation5], 1 }
  0x62   :  { %234 = vsyncpa [#allocation5 + $0x1], 1 }

</bundles_post_ra>
